<compile_context>
chip_gen: v6e
topology: v6e:2x2x1
jax: 0.10.0
libtpu: 0.0.40
codegen_flags: <defaults>
</compile_context>

<pallas_src>
import functools

import jax
import jax.numpy as jnp
from jax import lax
from jax.experimental import pallas as pl
from jax.experimental.pallas import tpu as pltpu


def _contrastive_2d_kernel(temp_ref, s_ref, o_ref, loss_ref,
                           row_m, row_l, col_m, col_l, *, inv_b):
    # temp_ref: (1,1) f32 SMEM. s_ref: (tile, D), o_ref: (tile, D) in VMEM
    # (bf16). loss_ref: (1,1) f32 VMEM, resident across the whole grid.
    # row_m/row_l: (tile,1) running row max/sum (reset every row tile).
    # col_m/col_l: (num_col_tiles, 1, tile) running column max/sum.
    i = pl.program_id(0)
    j = pl.program_id(1)
    ni = pl.num_programs(0)
    nj = pl.num_programs(1)

    scale = jnp.exp(temp_ref[0, 0])

    # ---------------- init ----------------
    @pl.when(jnp.logical_and(i == 0, j == 0))
    def _():
        loss_ref[...] = jnp.zeros_like(loss_ref)

    @pl.when(j == 0)
    def _():
        row_m[...] = jnp.full(row_m.shape, -jnp.inf, jnp.float32)
        row_l[...] = jnp.zeros(row_l.shape, jnp.float32)

    @pl.when(i == 0)
    def _():
        col_m[j] = jnp.full(col_m.shape[1:], -jnp.inf, jnp.float32)
        col_l[j] = jnp.zeros(col_l.shape[1:], jnp.float32)

    # ------- (tile, tile) logits block: bf16 operands, f32 MXU accumulation -------
    logits = lax.dot_general(
        s_ref[...], o_ref[...],
        dimension_numbers=(((1,), (1,)), ((), ())),
        preferred_element_type=jnp.float32,
    ) * scale

    # ------- online row logsumexp (reduction over column tiles j) -------
    rm_old = row_m[...]
    rm_new = jnp.maximum(rm_old, jnp.max(logits, axis=1, keepdims=True))
    row_l[...] = (row_l[...] * jnp.exp(rm_old - rm_new)
                  + jnp.sum(jnp.exp(logits - rm_new), axis=1, keepdims=True))
    row_m[...] = rm_new

    # ------- online column logsumexp (reduction over row tiles i) -------
    cm_old = col_m[j]
    cl_old = col_l[j]
    cm_new = jnp.maximum(cm_old, jnp.max(logits, axis=0, keepdims=True))
    col_l[j] = (cl_old * jnp.exp(cm_old - cm_new)
                + jnp.sum(jnp.exp(logits - cm_new), axis=0, keepdims=True))
    col_m[j] = cm_new

    # ------- diagonal (positive) logits: direct row-wise dot on i == j tile -------
    @pl.when(i == j)
    def _():
        prod = s_ref[...].astype(jnp.float32) * o_ref[...].astype(jnp.float32)
        diag_sum = jnp.sum(prod, keepdims=True) * scale             # (1, 1)
        loss_ref[...] += jnp.float32(-2.0 * inv_b) * diag_sum

    # ------- finalize this row tile once all column tiles have been seen -------
    @pl.when(j == nj - 1)
    def _():
        row_lse = row_m[...] + jnp.log(row_l[...])                  # (tile, 1)
        loss_ref[...] += jnp.float32(inv_b) * jnp.sum(row_lse, keepdims=True)

    # ------- finalize this column tile once all row tiles have been seen -------
    @pl.when(i == ni - 1)
    def _():
        col_lse = col_m[j] + jnp.log(col_l[j])                      # (1, tile)
        loss_ref[...] += jnp.float32(inv_b) * jnp.sum(col_lse, keepdims=True)


def _pick_tile(b):
    if b >= 512 and b % 256 == 0:
        return 256          # keeps v6e/v7x 256-wide MXU full
    if b % 128 == 0:
        return 128          # also fine on v5e's 128-wide MXU
    return b                # small / awkward batch: single tile along that axis


def contrastive_loss_2d_pallas(subject_codes, object_codes, temperature,
                               *, compute_dtype=jnp.bfloat16):
    """Symmetric contrastive loss (CLIP-style) for 2-D codes, fused in Pallas."""
    assert subject_codes.ndim == 2 and object_codes.ndim == 2
    b, d = subject_codes.shape
    assert object_codes.shape == (b, d), (
        "ContrastiveLoss expects square logits: subject/object batch and "
        "feature dims must match.")

    tile = _pick_tile(b)
    ni = nj = b // tile

    temp = jnp.asarray(temperature, jnp.float32).reshape(1, 1)
    s = subject_codes.astype(compute_dtype)
    o = object_codes.astype(compute_dtype)

    kernel = functools.partial(_contrastive_2d_kernel, inv_b=1.0 / b)

    out = pl.pallas_call(
        kernel,
        out_shape=jax.ShapeDtypeStruct((1, 1), jnp.float32),
        grid=(ni, nj),
        in_specs=[
            pl.BlockSpec(memory_space=pltpu.MemorySpace.SMEM),   # temperature
            pl.BlockSpec((tile, d), lambda i, j: (i, 0)),        # subject rows
            pl.BlockSpec((tile, d), lambda i, j: (j, 0)),        # object rows
        ],
        out_specs=pl.BlockSpec((1, 1), lambda i, j: (0, 0)),
        scratch_shapes=[
            pltpu.VMEM((tile, 1), jnp.float32),       # running row max
            pltpu.VMEM((tile, 1), jnp.float32),       # running row sum
            pltpu.VMEM((nj, 1, tile), jnp.float32),   # running col max per col tile
            pltpu.VMEM((nj, 1, tile), jnp.float32),   # running col sum per col tile
        ],
        compiler_params=pltpu.CompilerParams(
            dimension_semantics=("arbitrary", "arbitrary"),
            vmem_limit_bytes=32 * 1024 * 1024,
        ),
    )(temp, s, o)
    return out[0, 0]


class ContrastiveLossPallas:
    """Mirror of the PyTorch ContrastiveLoss module (2-D logits path)."""

    def __init__(self, use_heuristic_negative=False, overlap_loss_weight=1.0,
                 compute_dtype=jnp.bfloat16):
        self.use_heuristic_negative = use_heuristic_negative
        self.overlap_loss_weight = overlap_loss_weight
        self.compute_dtype = compute_dtype

    def __call__(self, subject_codes, object_codes, temperature):
        if subject_codes.ndim == 2:
            return contrastive_loss_2d_pallas(
                subject_codes, object_codes, temperature,
                compute_dtype=self.compute_dtype)
        # TODO(synk): 3-D logits branches (heuristic negatives / top-k mining)
        #             not translated to Pallas.
        raise NotImplementedError("Only 2-D subject/object codes supported.")


def _reference_loss(s, o, t):
    """Plain-JAX reference matching torch semantics (mean-reduced CE, sym)."""
    logits = (s @ o.T) * jnp.exp(t)
    b = logits.shape[0]
    idx = jnp.arange(b)

    def ce(l):
        return jnp.mean(jax.nn.logsumexp(l, axis=1) - l[idx, idx])

    return ce(logits) + ce(logits.T)


if __name__ == "__main__":
    loss_fn = ContrastiveLossPallas(use_heuristic_negative=False,
                                    overlap_loss_weight=1.0)
    key = jax.random.PRNGKey(0)
    temperature = jnp.float32(0.07)

    # (8, 32): single-tile path.  (256, 64): 2x2 grid -> exercises the online
    # row/column logsumexp accumulators and the i == j diagonal tile.
    for (B, D) in [(8, 32), (256, 64)]:
        k1, k2, key = jax.random.split(key, 3)
        subject_codes = jax.random.normal(k1, (B, D), dtype=jnp.float32)
        object_codes = jax.random.normal(k2, (B, D), dtype=jnp.float32)

        loss = loss_fn(subject_codes, object_codes, temperature)
        loss = jax.block_until_ready(loss)

        # Reference computed on the same bf16-rounded inputs the kernel feeds
        # to the MXU (f32 accumulation on both sides).
        s_q = subject_codes.astype(jnp.bfloat16).astype(jnp.float32)
        o_q = object_codes.astype(jnp.bfloat16).astype(jnp.float32)
        ref = _reference_loss(s_q, o_q, temperature)
        assert jnp.allclose(loss, ref, rtol=1e-4, atol=1e-4), (B, D, loss, ref)

    print("KERNEL_OK")
</pallas_src>

<mosaic_0001>
module attributes {stable_mosaic.version = 11 : i64} {
  func.func @_contrastive_2d_kernel(%arg0: i32, %arg1: i32, %arg2: memref<1x1xf32, #tpu.memory_space<smem>>, %arg3: memref<8x32xbf16, #tpu.memory_space<vmem>>, %arg4: memref<8x32xbf16, #tpu.memory_space<vmem>>, %arg5: memref<1x1xf32, #tpu.memory_space<vmem>>, %arg6: memref<8x1xf32, #tpu.memory_space<vmem>>, %arg7: memref<8x1xf32, #tpu.memory_space<vmem>>, %arg8: memref<1x1x8xf32, #tpu.memory_space<vmem>>, %arg9: memref<1x1x8xf32, #tpu.memory_space<vmem>>) attributes {dimension_semantics = [#tpu.dimension_semantics<arbitrary>, #tpu.dimension_semantics<arbitrary>], iteration_bounds = array<i64: 1, 1>, scalar_prefetch = 0 : i64, scratch_operands = 4 : i64, tpu.core_type = #tpu.core_type<tc>, window_params = [{transform_indices = @transform_0, window_bounds = array<i64: 1, 1>}, {transform_indices = @transform_1, window_bounds = array<i64: 8, 32>}, {transform_indices = @transform_2, window_bounds = array<i64: 8, 32>}, {pipeline_mode = #tpu.pipeline_mode<synchronous>, transform_indices = @transform_3, window_bounds = array<i64: 1, 1>}]} {
    %c0 = arith.constant 0 : index
    %c0_0 = arith.constant 0 : index
    %0 = memref.load %arg2[%c0, %c0_0] : memref<1x1xf32, #tpu.memory_space<smem>>
    %1 = math.exp %0 : f32
    %c0_i32 = arith.constant 0 : i32
    %2 = arith.cmpi eq, %arg0, %c0_i32 : i32
    %c0_i32_1 = arith.constant 0 : i32
    %3 = arith.cmpi eq, %arg1, %c0_i32_1 : i32
    %4 = arith.andi %2, %3 : i1
    %5 = arith.extui %4 : i1 to i32
    %c0_i32_2 = arith.constant 0 : i32
    %6 = arith.cmpi ne, %5, %c0_i32_2 : i32
    scf.if %6 {
      %cst_36 = arith.constant 0.000000e+00 : f32
      %69 = vector.broadcast %cst_36 : f32 to vector<1x1xf32>
      %c0_37 = arith.constant 0 : index
      %c0_38 = arith.constant 0 : index
      %70 = vector.load %arg5[%c0_37, %c0_38] : memref<1x1xf32, #tpu.memory_space<vmem>>, vector<1x1xf32>
      tpu.vector_store %arg5[%c0_37, %c0_38], %69 {strides = array<i32>} : memref<1x1xf32, #tpu.memory_space<vmem>>, vector<1x1xf32>,
    } else {
    }
    %c0_i32_3 = arith.constant 0 : i32
    %7 = arith.cmpi eq, %arg1, %c0_i32_3 : i32
    %8 = arith.extui %7 : i1 to i32
    %c0_i32_4 = arith.constant 0 : i32
    %9 = arith.cmpi ne, %8, %c0_i32_4 : i32
    scf.if %9 {
      %cst_36 = arith.constant 0xFF800000 : f32
      %69 = vector.broadcast %cst_36 : f32 to vector<8x1xf32>
      %c0_37 = arith.constant 0 : index
      %c0_38 = arith.constant 0 : index
      %70 = vector.load %arg6[%c0_37, %c0_38] : memref<8x1xf32, #tpu.memory_space<vmem>>, vector<8x1xf32>
      tpu.vector_store %arg6[%c0_37, %c0_38], %69 {strides = array<i32>} : memref<8x1xf32, #tpu.memory_space<vmem>>, vector<8x1xf32>,
      %cst_39 = arith.constant 0.000000e+00 : f32
      %71 = vector.broadcast %cst_39 : f32 to vector<8x1xf32>
      %c0_40 = arith.constant 0 : index
      %c0_41 = arith.constant 0 : index
      %72 = vector.load %arg7[%c0_40, %c0_41] : memref<8x1xf32, #tpu.memory_space<vmem>>, vector<8x1xf32>
      tpu.vector_store %arg7[%c0_40, %c0_41], %71 {strides = array<i32>} : memref<8x1xf32, #tpu.memory_space<vmem>>, vector<8x1xf32>,
    } else {
    }
    %c0_i32_5 = arith.constant 0 : i32
    %10 = arith.cmpi eq, %arg0, %c0_i32_5 : i32
    %11 = arith.extui %10 : i1 to i32
    %c0_i32_6 = arith.constant 0 : i32
    %12 = arith.cmpi ne, %11, %c0_i32_6 : i32
    scf.if %12 {
      %cst_36 = arith.constant 0xFF800000 : f32
      %69 = vector.broadcast %cst_36 : f32 to vector<1x8xf32>
      %70 = arith.index_cast %arg1 : i32 to index
      %c0_37 = arith.constant 0 : index
      %c0_38 = arith.constant 0 : index
      %71 = vector.load %arg8[%70, %c0_37, %c0_38] : memref<1x1x8xf32, #tpu.memory_space<vmem>>, vector<1x1x8xf32>
      %72 = vector.shape_cast %71 : vector<1x1x8xf32> to vector<1x8xf32>
      %73 = vector.shape_cast %69 : vector<1x8xf32> to vector<1x1x8xf32>
      tpu.vector_store %arg8[%70, %c0_37, %c0_38], %73 {strides = array<i32>} : memref<1x1x8xf32, #tpu.memory_space<vmem>>, vector<1x1x8xf32>,
      %cst_39 = arith.constant 0.000000e+00 : f32
      %74 = vector.broadcast %cst_39 : f32 to vector<1x8xf32>
      %75 = arith.index_cast %arg1 : i32 to index
      %c0_40 = arith.constant 0 : index
      %c0_41 = arith.constant 0 : index
      %76 = vector.load %arg9[%75, %c0_40, %c0_41] : memref<1x1x8xf32, #tpu.memory_space<vmem>>, vector<1x1x8xf32>
      %77 = vector.shape_cast %76 : vector<1x1x8xf32> to vector<1x8xf32>
      %78 = vector.shape_cast %74 : vector<1x8xf32> to vector<1x1x8xf32>
      tpu.vector_store %arg9[%75, %c0_40, %c0_41], %78 {strides = array<i32>} : memref<1x1x8xf32, #tpu.memory_space<vmem>>, vector<1x1x8xf32>,
    } else {
    }
    %c0_7 = arith.constant 0 : index
    %c0_8 = arith.constant 0 : index
    %13 = vector.load %arg3[%c0_7, %c0_8] : memref<8x32xbf16, #tpu.memory_space<vmem>>, vector<8x32xbf16>
    %c0_9 = arith.constant 0 : index
    %c0_10 = arith.constant 0 : index
    %14 = vector.load %arg4[%c0_9, %c0_10] : memref<8x32xbf16, #tpu.memory_space<vmem>>, vector<8x32xbf16>
    %cst = arith.constant dense<0.000000e+00> : vector<8x8xf32>
    %15 = tpu.matmul %13, %14, %cst {dimension_numbers = #tpu.dot_dimension_numbers<[1], [1], [0], [0], [0, 0, 1, 0], [], []>} : vector<8x32xbf16>, vector<8x32xbf16>, vector<8x8xf32> -> vector<8x8xf32>
    %16 = vector.broadcast %1 : f32 to vector<8x8xf32>
    %17 = arith.mulf %15, %16 : vector<8x8xf32>
    %c0_11 = arith.constant 0 : index
    %c0_12 = arith.constant 0 : index
    %18 = vector.load %arg6[%c0_11, %c0_12] : memref<8x1xf32, #tpu.memory_space<vmem>>, vector<8x1xf32>
    %cst_13 = arith.constant dense<0xFF800000> : vector<8xf32>
    %19 = vector.multi_reduction <maximumf>, %17, %cst_13 [1] : vector<8x8xf32> to vector<8xf32>
    %20 = vector.shape_cast %19 : vector<8xf32> to vector<8x1xf32>
    %21 = arith.maximumf %18, %20 : vector<8x1xf32>
    %c0_14 = arith.constant 0 : index
    %c0_15 = arith.constant 0 : index
    %22 = vector.load %arg7[%c0_14, %c0_15] : memref<8x1xf32, #tpu.memory_space<vmem>>, vector<8x1xf32>
    %23 = arith.subf %18, %21 : vector<8x1xf32>
    %24 = math.exp %23 : vector<8x1xf32>
    %25 = arith.mulf %22, %24 : vector<8x1xf32>
    %26 = vector.broadcast %21 : vector<8x1xf32> to vector<8x8xf32>
    %27 = arith.subf %17, %26 : vector<8x8xf32>
    %28 = math.exp %27 : vector<8x8xf32>
    %cst_16 = arith.constant dense<0.000000e+00> : vector<8xf32>
    %29 = vector.multi_reduction <add>, %28, %cst_16 [1] : vector<8x8xf32> to vector<8xf32>
    %30 = vector.shape_cast %29 : vector<8xf32> to vector<8x1xf32>
    %31 = arith.addf %25, %30 : vector<8x1xf32>
    %c0_17 = arith.constant 0 : index
    %c0_18 = arith.constant 0 : index
    %32 = vector.load %arg7[%c0_17, %c0_18] : memref<8x1xf32, #tpu.memory_space<vmem>>, vector<8x1xf32>
    tpu.vector_store %arg7[%c0_17, %c0_18], %31 {strides = array<i32>} : memref<8x1xf32, #tpu.memory_space<vmem>>, vector<8x1xf32>,
    %c0_19 = arith.constant 0 : index
    %c0_20 = arith.constant 0 : index
    %33 = vector.load %arg6[%c0_19, %c0_20] : memref<8x1xf32, #tpu.memory_space<vmem>>, vector<8x1xf32>
    tpu.vector_store %arg6[%c0_19, %c0_20], %21 {strides = array<i32>} : memref<8x1xf32, #tpu.memory_space<vmem>>, vector<8x1xf32>,
    %34 = arith.index_cast %arg1 : i32 to index
    %c0_21 = arith.constant 0 : index
    %c0_22 = arith.constant 0 : index
    %35 = vector.load %arg8[%34, %c0_21, %c0_22] : memref<1x1x8xf32, #tpu.memory_space<vmem>>, vector<1x1x8xf32>
    %36 = vector.shape_cast %35 : vector<1x1x8xf32> to vector<1x8xf32>
    %37 = arith.index_cast %arg1 : i32 to index
    %c0_23 = arith.constant 0 : index
    %c0_24 = arith.constant 0 : index
    %38 = vector.load %arg9[%37, %c0_23, %c0_24] : memref<1x1x8xf32, #tpu.memory_space<vmem>>, vector<1x1x8xf32>
    %39 = vector.shape_cast %38 : vector<1x1x8xf32> to vector<1x8xf32>
    %cst_25 = arith.constant dense<0xFF800000> : vector<8xf32>
    %40 = vector.multi_reduction <maximumf>, %17, %cst_25 [0] : vector<8x8xf32> to vector<8xf32>
    %41 = vector.shape_cast %40 : vector<8xf32> to vector<1x8xf32>
    %42 = arith.maximumf %36, %41 : vector<1x8xf32>
    %43 = arith.subf %36, %42 : vector<1x8xf32>
    %44 = math.exp %43 : vector<1x8xf32>
    %45 = arith.mulf %39, %44 : vector<1x8xf32>
    %46 = vector.broadcast %42 : vector<1x8xf32> to vector<8x8xf32>
    %47 = arith.subf %17, %46 : vector<8x8xf32>
    %48 = math.exp %47 : vector<8x8xf32>
    %cst_26 = arith.constant dense<0.000000e+00> : vector<8xf32>
    %49 = vector.multi_reduction <add>, %48, %cst_26 [0] : vector<8x8xf32> to vector<8xf32>
    %50 = vector.shape_cast %49 : vector<8xf32> to vector<1x8xf32>
    %51 = arith.addf %45, %50 : vector<1x8xf32>
    %52 = arith.index_cast %arg1 : i32 to index
    %c0_27 = arith.constant 0 : index
    %c0_28 = arith.constant 0 : index
    %53 = vector.load %arg9[%52, %c0_27, %c0_28] : memref<1x1x8xf32, #tpu.memory_space<vmem>>, vector<1x1x8xf32>
    %54 = vector.shape_cast %53 : vector<1x1x8xf32> to vector<1x8xf32>
    %55 = vector.shape_cast %51 : vector<1x8xf32> to vector<1x1x8xf32>
    tpu.vector_store %arg9[%52, %c0_27, %c0_28], %55 {strides = array<i32>} : memref<1x1x8xf32, #tpu.memory_space<vmem>>, vector<1x1x8xf32>,
    %56 = arith.index_cast %arg1 : i32 to index
    %c0_29 = arith.constant 0 : index
    %c0_30 = arith.constant 0 : index
    %57 = vector.load %arg8[%56, %c0_29, %c0_30] : memref<1x1x8xf32, #tpu.memory_space<vmem>>, vector<1x1x8xf32>
    %58 = vector.shape_cast %57 : vector<1x1x8xf32> to vector<1x8xf32>
    %59 = vector.shape_cast %42 : vector<1x8xf32> to vector<1x1x8xf32>
    tpu.vector_store %arg8[%56, %c0_29, %c0_30], %59 {strides = array<i32>} : memref<1x1x8xf32, #tpu.memory_space<vmem>>, vector<1x1x8xf32>,
    %60 = arith.cmpi eq, %arg0, %arg1 : i32
    %61 = arith.extui %60 : i1 to i32
    %c0_i32_31 = arith.constant 0 : i32
    %62 = arith.cmpi ne, %61, %c0_i32_31 : i32
    scf.if %62 {
      %c0_36 = arith.constant 0 : index
      %c0_37 = arith.constant 0 : index
      %69 = vector.load %arg3[%c0_36, %c0_37] : memref<8x32xbf16, #tpu.memory_space<vmem>>, vector<8x32xbf16>
      %70 = arith.extf %69 : vector<8x32xbf16> to vector<8x32xf32>
      %c0_38 = arith.constant 0 : index
      %c0_39 = arith.constant 0 : index
      %71 = vector.load %arg4[%c0_38, %c0_39] : memref<8x32xbf16, #tpu.memory_space<vmem>>, vector<8x32xbf16>
      %72 = arith.extf %71 : vector<8x32xbf16> to vector<8x32xf32>
      %73 = arith.mulf %70, %72 : vector<8x32xf32>
      %74 = vector.shape_cast %73 : vector<8x32xf32> to vector<1x8x32xf32>
      %cst_40 = arith.constant dense<0.000000e+00> : vector<1xf32>
      %75 = vector.multi_reduction <add>, %74, %cst_40 [1, 2] : vector<1x8x32xf32> to vector<1xf32>
      %76 = vector.shape_cast %75 : vector<1xf32> to vector<1x1x1xf32>
      %77 = vector.extract %76[0, 0, 0] : f32 from vector<1x1x1xf32>
      %78 = vector.broadcast %77 : f32 to vector<1x1xf32>
      %79 = vector.broadcast %1 : f32 to vector<1x1xf32>
      %80 = arith.mulf %78, %79 : vector<1x1xf32>
      %c0_41 = arith.constant 0 : index
      %c0_42 = arith.constant 0 : index
      %81 = vector.load %arg5[%c0_41, %c0_42] : memref<1x1xf32, #tpu.memory_space<vmem>>, vector<1x1xf32>
      %cst_43 = arith.constant -2.500000e-01 : f32
      %82 = vector.broadcast %cst_43 : f32 to vector<1x1xf32>
      %83 = arith.mulf %82, %80 : vector<1x1xf32>
      %84 = arith.addf %81, %83 : vector<1x1xf32>
      %c0_44 = arith.constant 0 : index
      %c0_45 = arith.constant 0 : index
      %85 = vector.load %arg5[%c0_44, %c0_45] : memref<1x1xf32, #tpu.memory_space<vmem>>, vector<1x1xf32>
      tpu.vector_store %arg5[%c0_44, %c0_45], %84 {strides = array<i32>} : memref<1x1xf32, #tpu.memory_space<vmem>>, vector<1x1xf32>,
    } else {
    }
    %c0_i32_32 = arith.constant 0 : i32
    %63 = arith.cmpi eq, %arg1, %c0_i32_32 : i32
    %64 = arith.extui %63 : i1 to i32
    %c0_i32_33 = arith.constant 0 : i32
    %65 = arith.cmpi ne, %64, %c0_i32_33 : i32
    scf.if %65 {
      %c0_36 = arith.constant 0 : index
      %c0_37 = arith.constant 0 : index
      %69 = vector.load %arg6[%c0_36, %c0_37] : memref<8x1xf32, #tpu.memory_space<vmem>>, vector<8x1xf32>
      %c0_38 = arith.constant 0 : index
      %c0_39 = arith.constant 0 : index
      %70 = vector.load %arg7[%c0_38, %c0_39] : memref<8x1xf32, #tpu.memory_space<vmem>>, vector<8x1xf32>
      %71 = math.log %70 : vector<8x1xf32>
      %72 = arith.addf %69, %71 : vector<8x1xf32>
      %c0_40 = arith.constant 0 : index
      %c0_41 = arith.constant 0 : index
      %73 = vector.load %arg5[%c0_40, %c0_41] : memref<1x1xf32, #tpu.memory_space<vmem>>, vector<1x1xf32>
      %74 = vector.shape_cast %72 : vector<8x1xf32> to vector<1x8x1xf32>
      %cst_42 = arith.constant dense<0.000000e+00> : vector<1xf32>
      %75 = vector.multi_reduction <add>, %74, %cst_42 [1, 2] : vector<1x8x1xf32> to vector<1xf32>
      %76 = vector.shape_cast %75 : vector<1xf32> to vector<1x1x1xf32>
      %77 = vector.extract %76[0, 0, 0] : f32 from vector<1x1x1xf32>
      %78 = vector.broadcast %77 : f32 to vector<1x1xf32>
      %cst_43 = arith.constant 1.250000e-01 : f32
      %79 = vector.broadcast %cst_43 : f32 to vector<1x1xf32>
      %80 = arith.mulf %79, %78 : vector<1x1xf32>
      %81 = arith.addf %73, %80 : vector<1x1xf32>
      %c0_44 = arith.constant 0 : index
      %c0_45 = arith.constant 0 : index
      %82 = vector.load %arg5[%c0_44, %c0_45] : memref<1x1xf32, #tpu.memory_space<vmem>>, vector<1x1xf32>
      tpu.vector_store %arg5[%c0_44, %c0_45], %81 {strides = array<i32>} : memref<1x1xf32, #tpu.memory_space<vmem>>, vector<1x1xf32>,
    } else {
    }
    %c0_i32_34 = arith.constant 0 : i32
    %66 = arith.cmpi eq, %arg0, %c0_i32_34 : i32
    %67 = arith.extui %66 : i1 to i32
    %c0_i32_35 = arith.constant 0 : i32
    %68 = arith.cmpi ne, %67, %c0_i32_35 : i32
    scf.if %68 {
      %69 = arith.index_cast %arg1 : i32 to index
      %c0_36 = arith.constant 0 : index
      %c0_37 = arith.constant 0 : index
      %70 = vector.load %arg8[%69, %c0_36, %c0_37] : memref<1x1x8xf32, #tpu.memory_space<vmem>>, vector<1x1x8xf32>
      %71 = vector.shape_cast %70 : vector<1x1x8xf32> to vector<1x8xf32>
      %72 = arith.index_cast %arg1 : i32 to index
      %c0_38 = arith.constant 0 : index
      %c0_39 = arith.constant 0 : index
      %73 = vector.load %arg9[%72, %c0_38, %c0_39] : memref<1x1x8xf32, #tpu.memory_space<vmem>>, vector<1x1x8xf32>
      %74 = vector.shape_cast %73 : vector<1x1x8xf32> to vector<1x8xf32>
      %75 = math.log %74 : vector<1x8xf32>
      %76 = arith.addf %71, %75 : vector<1x8xf32>
      %c0_40 = arith.constant 0 : index
      %c0_41 = arith.constant 0 : index
      %77 = vector.load %arg5[%c0_40, %c0_41] : memref<1x1xf32, #tpu.memory_space<vmem>>, vector<1x1xf32>
      %78 = vector.shape_cast %76 : vector<1x8xf32> to vector<1x1x8xf32>
      %cst_42 = arith.constant dense<0.000000e+00> : vector<1xf32>
      %79 = vector.multi_reduction <add>, %78, %cst_42 [1, 2] : vector<1x1x8xf32> to vector<1xf32>
      %80 = vector.shape_cast %79 : vector<1xf32> to vector<1x1x1xf32>
      %81 = vector.extract %80[0, 0, 0] : f32 from vector<1x1x1xf32>
      %82 = vector.broadcast %81 : f32 to vector<1x1xf32>
      %cst_43 = arith.constant 1.250000e-01 : f32
      %83 = vector.broadcast %cst_43 : f32 to vector<1x1xf32>
      %84 = arith.mulf %83, %82 : vector<1x1xf32>
      %85 = arith.addf %77, %84 : vector<1x1xf32>
      %c0_44 = arith.constant 0 : index
      %c0_45 = arith.constant 0 : index
      %86 = vector.load %arg5[%c0_44, %c0_45] : memref<1x1xf32, #tpu.memory_space<vmem>>, vector<1x1xf32>
      tpu.vector_store %arg5[%c0_44, %c0_45], %85 {strides = array<i32>} : memref<1x1xf32, #tpu.memory_space<vmem>>, vector<1x1xf32>,
    } else {
    }
    return
  }
  func.func @transform_0(%arg0: i32, %arg1: i32) -> (i32, i32) {
    %c0_i32 = arith.constant 0 : i32
    %c0_i32_0 = arith.constant 0 : i32
    %c0_i32_1 = arith.constant 0 : i32
    return %c0_i32, %c0_i32_0 : i32, i32
  }
  func.func @transform_1(%arg0: i32, %arg1: i32) -> (i32, i32) {
    %c0_i32 = arith.constant 0 : i32
    %c0_i32_0 = arith.constant 0 : i32
    return %arg0, %c0_i32 : i32, i32
  }
  func.func @transform_2(%arg0: i32, %arg1: i32) -> (i32, i32) {
    %c0_i32 = arith.constant 0 : i32
    %c0_i32_0 = arith.constant 0 : i32
    return %arg1, %c0_i32 : i32, i32
  }
  func.func @transform_3(%arg0: i32, %arg1: i32) -> (i32, i32) {
    %c0_i32 = arith.constant 0 : i32
    %c0_i32_0 = arith.constant 0 : i32
    %c0_i32_1 = arith.constant 0 : i32
    return %c0_i32, %c0_i32_0 : i32, i32
  }
}

</mosaic_0001>

<bundles_post_ra>
// kernel: tpu_custom_call.1
= control target key start
LH: loop header
LB: loop body
LE: loop exit
PB: predicated region body
PF: predicated region fallthrough
CT: control target
= control target key end

     0   :  { %9 = vsyncpa [#allocation8], 0  ;;  %s437_s0 = inlined_call_operand.<no memory space> [shape: f32[1,1], index: 0, kind: input, shape index: {}]   ;;  %s438_s1 = inlined_call_operand.hbm [shape: bf16[8,32], index: 1, kind: input, shape index: {}]   ;;  %s439_s2 = inlined_call_operand.hbm [shape: bf16[8,32], index: 2, kind: input, shape index: {}]   ;;  %s440_s3 = inlined_call_operand.hbm [shape: f32[1,1], index: 3, kind: output, shape index: {}]  }
   0x1   :  { %10 = vsyncpa [#allocation11], 0 }
   0x2   :  { %11 = vsyncpa [#allocation9], 0  ;;  %s371_s12 = smov [#allocation7]   ;;  %s372_s14 = smov [#allocation10]  }
   0x3   :  { %s20_s13 = sshll.u32 %s371_s12, 4  ;;  %s30_s15 = sshll.u32 %s372_s14, 4  ;;  %s21_s13 = int_to_ptr.vmem [resolvable:$true] %s20_s13  ;;  %s31_s15 = int_to_ptr.vmem [resolvable:$true] %s30_s15 }
   0x4   :  { %s313_s16 = scalar_lea.vmem %s21_s13, 64  ;;  %p318_p1 = scmp.lt.s32.totalorder %s21_s13, %s21_s13 }
   0x5   :  { %p314_p0 = scmp.ne.s32.totalorder %s21_s13, %s313_s16  ;;  %p319_p2 = scmp.lt.s32.totalorder %s313_s16, %s313_s16 }
   0x7   :  { %p320_p3 = por %p319_p2, %p318_p1 }
   0x9   :  { %p321_p4 = pnand %p320_p3, %p314_p0 }
   0xb   :  { %324 = shalt.err (!%p321_p4)
}
   0xc   :  { %23 = dma.hbm_to_vmem [thread:$0]  %s438_s1, 64, %s21_s13, [#allocation8]  }
   0xd   :  { %s333_s19 = scalar_lea.vmem %s31_s15, 64  ;;  %p338_p6 = scmp.lt.s32.totalorder %s31_s15, %s31_s15 }
   0xe   :  { %p334_p5 = scmp.ne.s32.totalorder %s31_s15, %s333_s19  ;;  %p339_p7 = scmp.lt.s32.totalorder %s333_s19, %s333_s19 }
  0x10   :  { %p340_p8 = por %p339_p7, %p338_p6 }
  0x12   :  { %p341_p9 = pnand %p340_p8, %p334_p5 }
  0x14   :  { %344 = shalt.err (!%p341_p9)
}
  0x15   :  { %33 = dma.hbm_to_vmem [thread:$0]  %s439_s2, 64, %s31_s15, [#allocation11]  }
  0x16   :  { %365 = dma.done.wait [#allocation8], 64  }
  0x17   :  { %366 = vsyncadd [#allocation8], 4294967232 }
  0x18   :  { %367 = dma.done.wait [#allocation11], 64  }
  0x19   :  { %368 = vsyncadd [#allocation11], 4294967232  ;;  %vm52_vm0 = vcmask 0   ;;  %vm57_vm1 = vcmask 7168   ;;  %v373_v0 = vmov 0.0   ;;  %v42_v1 = vstv %s437_s0  ;;  %s377_s25 = smov [#allocation12]  }
  0x1a   :  { %53 = vst.msk [vmem:[#allocation12] sm:$0x1] %vm52_vm0, %v373_v0  ;;  %269 = vmatprep.subr.bf16.mxu0 %v373_v0  ;;  %vm374_vm2 = vmmov 0   ;;  %v43_v2 = vmul.f32 1.442695, %v42_v1  ;;  %vm68_vm3 = vcmask 261120   ;;  %v157_v15 = vlaneseq }
  0x1b   :  { %59 = vst.msk [vmem:[#allocation3] sm:$0xff] %vm57_vm1, %v373_v0  ;;  %271 = vmatprep.mubr.msk.bf16.mxu0 %vm374_vm2, %v373_v0  ;;  %v67_v3 = vld [vmem:[#allocation10] sm:$0xf]  ;;  %v66_v5 = vld [vmem:[#allocation7] sm:$0xf]  ;;  %vm63_vm4 = vcmask 57344  }
  0x1c   :  { %291 = vpow2.f32 %v43_v2  ;;  %v73_v4 = vsel %vm68_vm3, %v67_v3, 0  ;;  %v375_v7 = vmov -inf   ;;  %65 = vst.msk [vmem:[#allocation5] sm:$0x1] %vm63_vm4, %v373_v0  ;;  %vm118_vm5 = vcmask 64512   ;;  %s256_s26 = sshll.u32 %s377_s25, 4  ;;  %s257_s26 = int_to_ptr.vmem [resolvable:$true] %s256_s26 }
  0x1d   :  { %270 = vmatpush3.bf16.xpose.msra.mxu0 %v73_v4  ;;  %64 = vst.msk [vmem:[#allocation4] sm:$0x1] %vm63_vm4, %v375_v7  ;;  %v158_v19 = vshrl.u32 %v157_v15, 7  ;;  %v376_v25 = vmov 0   ;;  %v180_v51 = vld [vmem:[#allocation7] sm:$0xf]  ;;  %p350_p11 = scmp.lt.s32.totalorder %s257_s26, %s257_s26 }
  0x1e   :  { %58 = vst.msk [vmem:[#allocation2] sm:$0xff] %vm57_vm1, %v375_v7  ;;  %290 = vset.pattern.permute.xlu0 %v376_v25  ;;  %v182_v52 = vld [vmem:[#allocation10] sm:$0xf]  ;;  %v181_v53 = vunpack.c.l.bf16 %v180_v51  ;;  %s345_s27 = scalar_lea.vmem %s257_s26, 16  ;;  %s349_s28 = scalar_lea.vmem %s257_s26, 32 }
  0x1f   :  { %v159_v23 = vsub.s32 0, %v158_v19  ;;  %v183_v54 = vunpack.c.l.bf16 %v182_v52  ;;  %p346_p10 = scmp.ne.s32.totalorder %s257_s26, %s345_s27  ;;  %p351_p12 = scmp.lt.s32.totalorder %s349_s28, %s345_s27 }
  0x21   :  { %v184_v55 = vmul.f32 %v183_v54, %v181_v53  ;;  %p352_p13 = por %p351_p12, %p350_p11 }
  0x22   :  { %v123_v61 = vld [vmem:[#allocation3] sm:$0xff] }
  0x23   :  { %v144_v39 = vld [vmem:[#allocation5] sm:$0x1]  ;;  %v185_v58 = vsel %vm68_vm3, %v184_v55, 0.0  ;;  %p353_p0 = pnand %p352_p13, %p346_p10 }
  0x24   :  { %272 = vmatmul.mubr.msk.bf16.vlgmr.msra.gmra.mxu0 %vm68_vm3, %v66_v5  ;;  %v143_v22 = vld [vmem:[#allocation4] sm:$0x1] }
  0x25   :  { %v117_v44 = vld [vmem:[#allocation2] sm:$0xff] }
  0x29   :  { %v292_v6 = vpop.eup %291 }
  0x2a   :  { %275 = vpush %v292_v6 }
  0x5b   :  { %s414_s0 = spop %275 }
  0x5c   :  { %v115_v8 = vstv %s414_s0 }
  0xe4   :  { %v109_v9 = vpop.f32.mrf.mxu0 }
  0xe5   :  { %v116_v10 = vmul.f32 %v115_v8, %v109_v9 }
  0xe6   :  { %v273_v11 = vpop.f32.mrf.mxu0 }
  0xe7   :  { %v119_v12 = vsel %vm118_vm5, %v116_v10, -inf }
  0xe8   :  { %120 = vmax.xlane.f32.xlu0 %v119_v12  ;;  %v145_v13 = vrot.slane %v119_v12, 4  ;;  %v112_v14 = vpop.f32.mrf.mxu0 }
  0xea   :  { %v146_v16 = vmax.f32 %v119_v12, %v145_v13  ;;  %v274_v17 = vpop.f32.mrf.mxu0 }
  0xec   :  { %v147_v18 = vrot.slane %v146_v16, 2 }
  0xee   :  { %v148_v20 = vmax.f32 %v146_v16, %v147_v18 }
  0xf0   :  { %v149_v21 = vrot.slane %v148_v20, 1 }
  0xf2   :  { %v150_v24 = vmax.f32 %v148_v20, %v149_v21 }
  0xf4   :  { %v151_v26 = vmax.f32 %v143_v22, %v150_v24 }
  0xf6   :  { %v160_v27 = vrot.slane %v151_v26, %v159_v23  ;;  %175 = vst.msk [vmem:[#allocation4] sm:$0x1] %vm63_vm4, %v151_v26  ;;  %v152_v30 = vsub.f32 %v143_v22, %v151_v26  ;;  %v197_v23 = vld [vmem:[#allocation12] sm:$0x1] }
  0xf8   :  { %v162_v28 = vsub.f32 %v116_v10, %v160_v27  ;;  %v153_v31 = vmul.f32 1.442695, %v152_v30 }
  0xfa   :  { %v163_v29 = vmul.f32 1.442695, %v162_v28 }
  0xfc   :  { %293 = vpow2.f32 %v163_v29 }
  0xfd   :  { %295 = vpow2.f32 %v153_v31  ;;  %v229_v17 = vld [vmem:[#allocation4] sm:$0x1] }
 0x109   :  { %v294_v32 = vpop.eup %293 }
 0x10a   :  { %v165_v33 = vsel %vm118_vm5, %v294_v32, 0.0  ;;  %v296_v38 = vpop.eup %295 }
 0x10b   :  { %v166_v34 = vrot.slane %v165_v33, 4  ;;  %v155_v42 = vmul.f32 %v296_v38, %v144_v39 }
 0x10d   :  { %v167_v35 = vadd.f32 %v166_v34, %v165_v33 }
 0x10f   :  { %v168_v36 = vrot.slane %v167_v35, 2 }
 0x111   :  { %v169_v37 = vadd.f32 %v168_v36, %v167_v35 }
 0x113   :  { %v170_v40 = vrot.slane %v169_v37, 1 }
 0x115   :  { %v171_v41 = vadd.f32 %v170_v40, %v169_v37 }
 0x117   :  { %v172_v43 = vadd.f32 %v171_v41, %v155_v42 }
 0x119   :  { %174 = vst.msk [vmem:[#allocation5] sm:$0x1] %vm63_vm4, %v172_v43 }
 0x120   :  { %v230_v3 = vld [vmem:[#allocation5] sm:$0x1] }
 0x171   :  { %v121_v45 = vpop.xlane.xlu0 %120 }
 0x172   :  { %v122_v46 = vmax.f32 %v117_v44, %v121_v45 }
 0x174   :  { %v124_v47 = vsub.f32 %v117_v44, %v122_v46  ;;  %142 = vst.msk [vmem:[#allocation2] sm:$0xff] %vm57_vm1, %v122_v46  ;;  %130 = vperm.xlu0 %290, %v122_v46  }
 0x176   :  { %v125_v59 = vmul.f32 1.442695, %v124_v47 }
 0x17b   :  { %v205_v15 = vld [vmem:[#allocation2] sm:$0xff] }
 0x1ef   :  { %v131_v48 = vpop.permute.xlu0 %130 }
 0x1f0   :  { %v133_v49 = vsub.f32 %v116_v10, %v131_v48 }
 0x1f2   :  { %v134_v50 = vmul.f32 1.442695, %v133_v49 }
 0x1f4   :  { %297 = vpow2.f32 %v134_v50 }
 0x1f5   :  { %299 = vpow2.f32 %v125_v59 }
 0x1f6   :  { %301 = vlog2.f32 %v230_v3 }
 0x201   :  { %v298_v56 = vpop.eup %297 }
 0x202   :  { %v136_v57 = vsel %vm118_vm5, %v298_v56, 0.0  ;;  %v300_v60 = vpop.eup %299 }
 0x203   :  { %137 = vadd.xlane.f32.xlu1 %v136_v57  ;;  %v127_v62 = vmul.f32 %v300_v60, %v123_v61  ;;  %v302_v11 = vpop.eup %301 }
 0x204   :  { %v232_v14 = vmul.f32 0.6931472, %v302_v11 }
 0x206   :  { %v233_v19 = vadd.f32 %v232_v14, %v229_v17 }
 0x207   :  { %186 = vadd.xlane.f32.xlu1 %v185_v58 }
 0x208   :  { %v235_v20 = vsel %vm63_vm4, %v233_v19, 0.0 }
 0x28c   :  { %v138_v63 = vpop.xlane.xlu1 %137 }
 0x28d   :  { %v139_v0 = vadd.f32 %v138_v63, %v127_v62 }
 0x28f   :  { %141 = vst.msk [vmem:[#allocation3] sm:$0xff] %vm57_vm1, %v139_v0 }
 0x290   :  { %v187_v1 = vpop.xlane.xlu1 %186 }
 0x291   :  { %v188_v2 = vrot.slane %v187_v1, 4 }
 0x293   :  { %v189_v4 = vadd.f32 %v188_v2, %v187_v1 }
 0x295   :  { %v190_v5 = vrot.slane %v189_v4, 2 }
 0x296   :  { %v206_v6 = vld [vmem:[#allocation3] sm:$0xff] }
 0x297   :  { %v191_v7 = vadd.f32 %v190_v5, %v189_v4  ;;  %303 = vlog2.f32 %v206_v6 }
 0x299   :  { %v192_v9 = vrot.slane %v191_v7, 1 }
 0x29b   :  { %v193_v10 = vadd.f32 %v192_v9, %v191_v7 }
 0x29d   :  { %277 = vpush %v193_v10 }
 0x2a4   :  { %v304_v12 = vpop.eup %303 }
 0x2a5   :  { %v208_v13 = vmul.f32 0.6931472, %v304_v12 }
 0x2a7   :  { %v209_v16 = vadd.f32 %v208_v13, %v205_v15 }
 0x2a9   :  { %v211_v18 = vsel %vm57_vm1, %v209_v16, 0.0 }
 0x2aa   :  { %212 = vadd.xlane.f32.xlu1 %v211_v18 }
 0x2ae   :  { %236 = vadd.xlane.f32.xlu1 %v235_v20 }
 0x2ce   :  { %s278_s2 = spop %277 }
 0x2cf   :  { %v195_v21 = vstv %s278_s2 }
 0x2d0   :  { %v196_v22 = vmul.f32 %v195_v21, %v115_v8 }
 0x2d2   :  { %v198_v24 = vmul.f32 -0.25, %v196_v22 }
 0x2d4   :  { %v199_v25 = vadd.f32 %v198_v24, %v197_v23 }
 0x2d6   :  { %201 = vst.msk [vmem:[#allocation12] sm:$0x1] %vm52_vm0, %v199_v25 }
 0x2dd   :  { %v210_v41 = vld [vmem:[#allocation12] sm:$0x1] }
 0x333   :  { %v213_v26 = vpop.xlane.xlu1 %212 }
 0x334   :  { %v214_v27 = vrot.slane %v213_v26, 4 }
 0x336   :  { %v215_v28 = vadd.f32 %v214_v27, %v213_v26 }
 0x337   :  { %v237_v29 = vpop.xlane.xlu1 %236 }
 0x338   :  { %v216_v30 = vrot.slane %v215_v28, 2  ;;  %v238_v31 = vrot.slane %v237_v29, 4 }
 0x33a   :  { %v239_v32 = vadd.f32 %v238_v31, %v237_v29  ;;  %v217_v33 = vadd.f32 %v216_v30, %v215_v28 }
 0x33c   :  { %v240_v34 = vrot.slane %v239_v32, 2  ;;  %v218_v35 = vrot.slane %v217_v33, 1 }
 0x33e   :  { %v241_v36 = vadd.f32 %v240_v34, %v239_v32  ;;  %v219_v37 = vadd.f32 %v218_v35, %v217_v33 }
 0x340   :  { %279 = vpush %v219_v37  ;;  %v242_v38 = vrot.slane %v241_v36, 1 }
 0x342   :  { %v243_v8 = vadd.f32 %v242_v38, %v241_v36 }
 0x344   :  { %281 = vpush %v243_v8 }
 0x371   :  { %s280_s23 = spop %279 }
 0x372   :  { %v221_v39 = vstv %s280_s23 }
 0x373   :  { %v222_v40 = vmul.f32 0.125, %v221_v39 }
 0x375   :  { %v223_v42 = vadd.f32 %v222_v40, %v210_v41  ;;  %s282_s24 = spop %281 }
 0x376   :  { %v245_v43 = vstv %s282_s24 }
 0x377   :  { %225 = vst.msk [vmem:[#allocation12] sm:$0x1] %vm52_vm0, %v223_v42  ;;  %v246_v44 = vmul.f32 0.125, %v245_v43 }
 0x37e   :  { %v234_v45 = vld [vmem:[#allocation12] sm:$0x1] }
 0x37f   :  { %v247_v46 = vadd.f32 %v246_v44, %v234_v45 }
 0x381   :  { %249 = vst.msk [vmem:[#allocation12] sm:$0x1] %vm52_vm0, %v247_v46 }
 0x382   :  { %356 = shalt.err (!%p353_p0)
}
 0x383   :  { %259 = dma.vmem_to_hbm [thread:$0]  %s257_s26, 16, %s440_s3, [#allocation9]  }
 0x384   :  { %369 = dma.done.wait [#allocation9], 16  }
 0x385   :  { %370 = vsyncadd [#allocation9], 4294967280 }
 0x386   :  { %263 = vsyncpa [#allocation8], 1 }
 0x387   :  { %264 = vsyncpa [#allocation11], 1 }
 0x388   :  { %265 = vsyncpa [#allocation9], 1 }

</bundles_post_ra>
